<compile_context>
chip_gen: v6e
topology: v6e:2x2x1
jax: 0.10.0
libtpu: 0.0.40
codegen_flags: <defaults>
</compile_context>

<pallas_src>
import numpy as np
import jax
import jax.numpy as jnp
from jax.experimental import pallas as pl
from jax.experimental.pallas import tpu as pltpu

KSIZE = 3
STRIDE = 2
PADDING = (KSIZE - 1) // 2
EPS = 1e-5  # InstanceNorm1d default


def _make_kernel(cin, cout, L, ksize, stride, padding, Lout, M):
    inv_n = 1.0 / float(Lout)

    def kernel(x_ref, w_ref, o_ref, acc_ref):
        # x: (Cin, L); w: (K*Cout, Cin) lane-dense. Keep operands in native
        # dtype; accumulate in f32 on the MXU.
        x = x_ref[0]
        w = w_ref[...]

        # One fused MXU matmul for all K taps: rows [k*Cout:(k+1)*Cout] hold
        # contrib_k[co, l] = sum_ci W[ci, co, k] * x[ci, l].
        full = jnp.dot(w, x, preferred_element_type=jnp.float32)  # (K*Cout, L)

        # Planar accumulator: plane r holds output positions t = m*stride + r.
        # Zero it so untouched (pad / uncovered) slots are exactly 0, which
        # keeps the un-masked InstanceNorm sums equal to sums over the Lout
        # valid positions.
        acc_ref[...] = jnp.zeros_like(acc_ref)

        # Each tap k is a statically-shifted slice-add into one residue plane
        # (t = l*stride - padding + k = (l+q)*stride + r).
        for k in range(ksize):
            contrib = full[k * cout:(k + 1) * cout, :]      # (Cout, L)
            q, r = divmod(k - padding, stride)
            l_lo = max(0, -q)                               # keep t >= 0
            m_hi = (Lout - 1 - r) // stride                 # max valid plane idx
            l_hi = min(L - 1, m_hi - q)                     # inclusive
            if l_hi >= l_lo:
                nv = l_hi - l_lo + 1
                off = l_lo + q                              # plane index m = l + q
                acc_ref[r, :, off:off + nv] += contrib[:, l_lo:l_lo + nv]

        # One-pass InstanceNorm stats (biased var) on the planar layout.
        planes = [acc_ref[r] for r in range(stride)]        # each (Cout, M) f32
        ssum = jnp.zeros((cout, 1), jnp.float32)
        ssq = jnp.zeros((cout, 1), jnp.float32)
        for p in planes:
            ssum = ssum + jnp.sum(p, axis=-1, keepdims=True)
            ssq = ssq + jnp.sum(p * p, axis=-1, keepdims=True)
        mean = ssum * inv_n
        var = jnp.maximum(ssq * inv_n - mean * mean, 0.0)
        scale = jax.lax.rsqrt(var + EPS)

        # Normalize + ReLU per plane; output stays planar (plane-major slabs);
        # the interleave happens as a reshape in the XLA wrapper.
        for r in range(stride):
            yr = jnp.maximum((planes[r] - mean) * scale, 0.0)
            o_ref[0, :, r * M:(r + 1) * M] = yr.astype(o_ref.dtype)

    return kernel


def upsample_forward(x, w, *, ksize=KSIZE, stride=STRIDE, padding=PADDING):
    N, cin, L = x.shape
    cin_w, cout, K = w.shape
    assert cin == cin_w and K == ksize
    Lout = (L - 1) * stride - 2 * padding + ksize
    M = -(-Lout // stride)  # ceil(Lout / stride): per-residue plane length

    # Lane-dense fused weight: (K*Cout, Cin); row k*Cout + co == W[:, co, k].
    w_flat = jnp.transpose(w, (2, 1, 0)).reshape(ksize * cout, cin)

    kernel = _make_kernel(cin, cout, L, ksize, stride, padding, Lout, M)

    y_planar = pl.pallas_call(
        kernel,
        out_shape=jax.ShapeDtypeStruct((N, cout, stride * M), x.dtype),
        grid_spec=pltpu.PrefetchScalarGridSpec(
            num_scalar_prefetch=0,
            grid=(N,),
            in_specs=[
                pl.BlockSpec((1, cin, L), lambda n: (n, 0, 0)),
                pl.BlockSpec((ksize * cout, cin), lambda n: (0, 0)),
            ],
            out_specs=pl.BlockSpec((1, cout, stride * M), lambda n: (n, 0, 0)),
            scratch_shapes=[pltpu.VMEM((stride, cout, M), jnp.float32)],
        ),
        compiler_params=pltpu.CompilerParams(
            dimension_semantics=("parallel",)),
    )(x, w_flat)

    # Planar (Cout, stride, M) -> interleaved (Cout, Lout): pure layout plumbing
    # kept outside the kernel.
    # TODO(synk): for large Cout / small N, add a parallel Cout grid axis and
    # fold multiple samples per grid step to bound VMEM on v7x / amortize
    # per-step overhead.
    y = (y_planar.reshape(N, cout, stride, M)
                 .transpose(0, 1, 3, 2)
                 .reshape(N, cout, stride * M)[:, :, :Lout])
    return y


def reference(x, w, stride, padding):
    # Pure numpy reference of ConvTranspose1d (no bias) + InstanceNorm1d + ReLU.
    x = np.asarray(x, np.float32)
    w = np.asarray(w, np.float32)
    N, Cin, L = x.shape
    _, Cout, K = w.shape
    Lout = (L - 1) * stride - 2 * padding + K
    out = np.zeros((N, Cout, Lout), np.float32)
    for n in range(N):
        for l in range(L):
            for k in range(K):
                t = l * stride - padding + k
                if 0 <= t < Lout:
                    out[n, :, t] += x[n, :, l] @ w[:, :, k]
    mean = out.mean(-1, keepdims=True)
    var = out.var(-1, keepdims=True)  # biased, matches InstanceNorm
    out = (out - mean) / np.sqrt(var + EPS)
    return np.maximum(out, 0.0)


if __name__ == "__main__":
    key = jax.random.PRNGKey(0)
    kx, kw = jax.random.split(key)

    N, cin, cout, L = 2, 4, 4, 16
    x = jax.random.normal(kx, (N, cin, L), dtype=jnp.float32)
    # Deterministic weight init (uniform, PyTorch-style bound); bias=False since norm=True.
    bound = 1.0 / np.sqrt(cout * KSIZE)
    w = jax.random.uniform(kw, (cin, cout, KSIZE), jnp.float32, -bound, bound)

    out = upsample_forward(x, w)
    out = jax.block_until_ready(out)

    ref = reference(x, w, STRIDE, PADDING)
    np.testing.assert_allclose(np.asarray(out), ref, atol=1e-4, rtol=1e-4)
    print("KERNEL_OK")
</pallas_src>

<mosaic_0001>
module attributes {stable_mosaic.version = 11 : i64} {
  func.func @kernel(%arg0: i32, %arg1: memref<1x4x16xf32, #tpu.memory_space<vmem>>, %arg2: memref<12x4xf32, #tpu.memory_space<vmem>>, %arg3: memref<1x4x32xf32, #tpu.memory_space<vmem>>, %arg4: memref<2x4x16xf32, #tpu.memory_space<vmem>>) attributes {dimension_semantics = [#tpu.dimension_semantics<parallel>], iteration_bounds = array<i64: 2>, scalar_prefetch = 0 : i64, scratch_operands = 1 : i64, tpu.core_type = #tpu.core_type<tc>, window_params = [{transform_indices = @transform_0, window_bounds = array<i64: 1, 4, 16>}, {pipeline_mode = #tpu.pipeline_mode<synchronous>, transform_indices = @transform_1, window_bounds = array<i64: 12, 4>}, {transform_indices = @transform_2, window_bounds = array<i64: 1, 4, 32>}]} {
    %c0 = arith.constant 0 : index
    %c0_0 = arith.constant 0 : index
    %c0_1 = arith.constant 0 : index
    %0 = vector.load %arg1[%c0, %c0_0, %c0_1] : memref<1x4x16xf32, #tpu.memory_space<vmem>>, vector<1x4x16xf32>
    %1 = vector.shape_cast %0 : vector<1x4x16xf32> to vector<4x16xf32>
    %c0_2 = arith.constant 0 : index
    %c0_3 = arith.constant 0 : index
    %2 = vector.load %arg2[%c0_2, %c0_3] : memref<12x4xf32, #tpu.memory_space<vmem>>, vector<12x4xf32>
    %cst = arith.constant dense<0.000000e+00> : vector<12x16xf32>
    %3 = tpu.matmul %2, %1, %cst {dimension_numbers = #tpu.dot_dimension_numbers<[1], [0], [0], [1], [0, 0, 1, 1], [], []>} : vector<12x4xf32>, vector<4x16xf32>, vector<12x16xf32> -> vector<12x16xf32>
    %cst_4 = arith.constant 0.000000e+00 : f32
    %4 = vector.broadcast %cst_4 : f32 to vector<2x4x16xf32>
    %c0_5 = arith.constant 0 : index
    %c0_6 = arith.constant 0 : index
    %c0_7 = arith.constant 0 : index
    %5 = vector.load %arg4[%c0_5, %c0_6, %c0_7] : memref<2x4x16xf32, #tpu.memory_space<vmem>>, vector<2x4x16xf32>
    tpu.vector_store %arg4[%c0_5, %c0_6, %c0_7], %4 {strides = array<i32>} : memref<2x4x16xf32, #tpu.memory_space<vmem>>, vector<2x4x16xf32>,
    %6 = vector.extract_strided_slice %3 {offsets = [0, 0], sizes = [4, 16], strides = [1, 1]} : vector<12x16xf32> to vector<4x16xf32>
    %c1 = arith.constant 1 : index
    %c0_8 = arith.constant 0 : index
    %c0_9 = arith.constant 0 : index
    %7 = vector.load %arg4[%c1, %c0_8, %c0_9] : memref<2x4x16xf32, #tpu.memory_space<vmem>>, vector<1x4x15xf32>
    %8 = vector.shape_cast %7 : vector<1x4x15xf32> to vector<4x15xf32>
    %9 = vector.extract_strided_slice %6 {offsets = [0, 1], sizes = [4, 15], strides = [1, 1]} : vector<4x16xf32> to vector<4x15xf32>
    %10 = arith.addf %8, %9 : vector<4x15xf32>
    %c1_10 = arith.constant 1 : index
    %c0_11 = arith.constant 0 : index
    %c0_12 = arith.constant 0 : index
    %11 = vector.load %arg4[%c1_10, %c0_11, %c0_12] : memref<2x4x16xf32, #tpu.memory_space<vmem>>, vector<1x4x15xf32>
    %12 = vector.shape_cast %11 : vector<1x4x15xf32> to vector<4x15xf32>
    %13 = vector.shape_cast %10 : vector<4x15xf32> to vector<1x4x15xf32>
    tpu.vector_store %arg4[%c1_10, %c0_11, %c0_12], %13 {strides = array<i32>} : memref<2x4x16xf32, #tpu.memory_space<vmem>>, vector<1x4x15xf32>,
    %14 = vector.extract_strided_slice %3 {offsets = [4, 0], sizes = [4, 16], strides = [1, 1]} : vector<12x16xf32> to vector<4x16xf32>
    %c0_13 = arith.constant 0 : index
    %c0_14 = arith.constant 0 : index
    %c0_15 = arith.constant 0 : index
    %15 = vector.load %arg4[%c0_13, %c0_14, %c0_15] : memref<2x4x16xf32, #tpu.memory_space<vmem>>, vector<1x4x16xf32>
    %16 = vector.shape_cast %15 : vector<1x4x16xf32> to vector<4x16xf32>
    %17 = arith.addf %16, %14 : vector<4x16xf32>
    %c0_16 = arith.constant 0 : index
    %c0_17 = arith.constant 0 : index
    %c0_18 = arith.constant 0 : index
    %18 = vector.load %arg4[%c0_16, %c0_17, %c0_18] : memref<2x4x16xf32, #tpu.memory_space<vmem>>, vector<1x4x16xf32>
    %19 = vector.shape_cast %18 : vector<1x4x16xf32> to vector<4x16xf32>
    %20 = vector.shape_cast %17 : vector<4x16xf32> to vector<1x4x16xf32>
    tpu.vector_store %arg4[%c0_16, %c0_17, %c0_18], %20 {strides = array<i32>} : memref<2x4x16xf32, #tpu.memory_space<vmem>>, vector<1x4x16xf32>,
    %21 = vector.extract_strided_slice %3 {offsets = [8, 0], sizes = [4, 16], strides = [1, 1]} : vector<12x16xf32> to vector<4x16xf32>
    %c1_19 = arith.constant 1 : index
    %c0_20 = arith.constant 0 : index
    %c0_21 = arith.constant 0 : index
    %22 = vector.load %arg4[%c1_19, %c0_20, %c0_21] : memref<2x4x16xf32, #tpu.memory_space<vmem>>, vector<1x4x15xf32>
    %23 = vector.shape_cast %22 : vector<1x4x15xf32> to vector<4x15xf32>
    %24 = vector.extract_strided_slice %21 {offsets = [0, 0], sizes = [4, 15], strides = [1, 1]} : vector<4x16xf32> to vector<4x15xf32>
    %25 = arith.addf %23, %24 : vector<4x15xf32>
    %c1_22 = arith.constant 1 : index
    %c0_23 = arith.constant 0 : index
    %c0_24 = arith.constant 0 : index
    %26 = vector.load %arg4[%c1_22, %c0_23, %c0_24] : memref<2x4x16xf32, #tpu.memory_space<vmem>>, vector<1x4x15xf32>
    %27 = vector.shape_cast %26 : vector<1x4x15xf32> to vector<4x15xf32>
    %28 = vector.shape_cast %25 : vector<4x15xf32> to vector<1x4x15xf32>
    tpu.vector_store %arg4[%c1_22, %c0_23, %c0_24], %28 {strides = array<i32>} : memref<2x4x16xf32, #tpu.memory_space<vmem>>, vector<1x4x15xf32>,
    %c0_25 = arith.constant 0 : index
    %c0_26 = arith.constant 0 : index
    %c0_27 = arith.constant 0 : index
    %29 = vector.load %arg4[%c0_25, %c0_26, %c0_27] : memref<2x4x16xf32, #tpu.memory_space<vmem>>, vector<1x4x16xf32>
    %30 = vector.shape_cast %29 : vector<1x4x16xf32> to vector<4x16xf32>
    %c1_28 = arith.constant 1 : index
    %c0_29 = arith.constant 0 : index
    %c0_30 = arith.constant 0 : index
    %31 = vector.load %arg4[%c1_28, %c0_29, %c0_30] : memref<2x4x16xf32, #tpu.memory_space<vmem>>, vector<1x4x16xf32>
    %32 = vector.shape_cast %31 : vector<1x4x16xf32> to vector<4x16xf32>
    %cst_31 = arith.constant 0.000000e+00 : f32
    %33 = vector.broadcast %cst_31 : f32 to vector<4x1xf32>
    %cst_32 = arith.constant 0.000000e+00 : f32
    %34 = vector.broadcast %cst_32 : f32 to vector<4x1xf32>
    %cst_33 = arith.constant dense<0.000000e+00> : vector<4xf32>
    %35 = vector.multi_reduction <add>, %30, %cst_33 [1] : vector<4x16xf32> to vector<4xf32>
    %36 = vector.shape_cast %35 : vector<4xf32> to vector<4x1xf32>
    %37 = arith.addf %33, %36 : vector<4x1xf32>
    %38 = arith.mulf %30, %30 : vector<4x16xf32>
    %cst_34 = arith.constant dense<0.000000e+00> : vector<4xf32>
    %39 = vector.multi_reduction <add>, %38, %cst_34 [1] : vector<4x16xf32> to vector<4xf32>
    %40 = vector.shape_cast %39 : vector<4xf32> to vector<4x1xf32>
    %41 = arith.addf %34, %40 : vector<4x1xf32>
    %cst_35 = arith.constant dense<0.000000e+00> : vector<4xf32>
    %42 = vector.multi_reduction <add>, %32, %cst_35 [1] : vector<4x16xf32> to vector<4xf32>
    %43 = vector.shape_cast %42 : vector<4xf32> to vector<4x1xf32>
    %44 = arith.addf %37, %43 : vector<4x1xf32>
    %45 = arith.mulf %32, %32 : vector<4x16xf32>
    %cst_36 = arith.constant dense<0.000000e+00> : vector<4xf32>
    %46 = vector.multi_reduction <add>, %45, %cst_36 [1] : vector<4x16xf32> to vector<4xf32>
    %47 = vector.shape_cast %46 : vector<4xf32> to vector<4x1xf32>
    %48 = arith.addf %41, %47 : vector<4x1xf32>
    %cst_37 = arith.constant 0.0322580636 : f32
    %49 = vector.broadcast %cst_37 : f32 to vector<4x1xf32>
    %50 = arith.mulf %44, %49 : vector<4x1xf32>
    %cst_38 = arith.constant 0.0322580636 : f32
    %51 = vector.broadcast %cst_38 : f32 to vector<4x1xf32>
    %52 = arith.mulf %48, %51 : vector<4x1xf32>
    %53 = arith.mulf %50, %50 : vector<4x1xf32>
    %54 = arith.subf %52, %53 : vector<4x1xf32>
    %cst_39 = arith.constant 0.000000e+00 : f32
    %55 = vector.broadcast %cst_39 : f32 to vector<4x1xf32>
    %56 = arith.maximumf %54, %55 : vector<4x1xf32>
    %cst_40 = arith.constant 9.99999974E-6 : f32
    %57 = vector.broadcast %cst_40 : f32 to vector<4x1xf32>
    %58 = arith.addf %56, %57 : vector<4x1xf32>
    %59 = math.rsqrt %58 : vector<4x1xf32>
    %60 = vector.broadcast %50 : vector<4x1xf32> to vector<4x16xf32>
    %61 = arith.subf %30, %60 : vector<4x16xf32>
    %62 = vector.broadcast %59 : vector<4x1xf32> to vector<4x16xf32>
    %63 = arith.mulf %61, %62 : vector<4x16xf32>
    %cst_41 = arith.constant 0.000000e+00 : f32
    %64 = vector.broadcast %cst_41 : f32 to vector<4x16xf32>
    %65 = arith.maximumf %63, %64 : vector<4x16xf32>
    %c0_42 = arith.constant 0 : index
    %c0_43 = arith.constant 0 : index
    %c0_44 = arith.constant 0 : index
    %66 = vector.load %arg3[%c0_42, %c0_43, %c0_44] : memref<1x4x32xf32, #tpu.memory_space<vmem>>, vector<1x4x16xf32>
    %67 = vector.shape_cast %66 : vector<1x4x16xf32> to vector<4x16xf32>
    %68 = vector.shape_cast %65 : vector<4x16xf32> to vector<1x4x16xf32>
    tpu.vector_store %arg3[%c0_42, %c0_43, %c0_44], %68 {strides = array<i32>} : memref<1x4x32xf32, #tpu.memory_space<vmem>>, vector<1x4x16xf32>,
    %69 = vector.broadcast %50 : vector<4x1xf32> to vector<4x16xf32>
    %70 = arith.subf %32, %69 : vector<4x16xf32>
    %71 = vector.broadcast %59 : vector<4x1xf32> to vector<4x16xf32>
    %72 = arith.mulf %70, %71 : vector<4x16xf32>
    %cst_45 = arith.constant 0.000000e+00 : f32
    %73 = vector.broadcast %cst_45 : f32 to vector<4x16xf32>
    %74 = arith.maximumf %72, %73 : vector<4x16xf32>
    %c0_46 = arith.constant 0 : index
    %c0_47 = arith.constant 0 : index
    %c16 = arith.constant 16 : index
    %75 = vector.load %arg3[%c0_46, %c0_47, %c16] : memref<1x4x32xf32, #tpu.memory_space<vmem>>, vector<1x4x16xf32>
    %76 = vector.shape_cast %75 : vector<1x4x16xf32> to vector<4x16xf32>
    %77 = vector.shape_cast %74 : vector<4x16xf32> to vector<1x4x16xf32>
    tpu.vector_store %arg3[%c0_46, %c0_47, %c16], %77 {strides = array<i32>} : memref<1x4x32xf32, #tpu.memory_space<vmem>>, vector<1x4x16xf32>,
    return
  }
  func.func @transform_0(%arg0: i32) -> (i32, i32, i32) {
    %c0_i32 = arith.constant 0 : i32
    %c0_i32_0 = arith.constant 0 : i32
    %c0_i32_1 = arith.constant 0 : i32
    return %arg0, %c0_i32, %c0_i32_0 : i32, i32, i32
  }
  func.func @transform_1(%arg0: i32) -> (i32, i32) {
    %c0_i32 = arith.constant 0 : i32
    %c0_i32_0 = arith.constant 0 : i32
    %c0_i32_1 = arith.constant 0 : i32
    return %c0_i32, %c0_i32_0 : i32, i32
  }
  func.func @transform_2(%arg0: i32) -> (i32, i32, i32) {
    %c0_i32 = arith.constant 0 : i32
    %c0_i32_0 = arith.constant 0 : i32
    %c0_i32_1 = arith.constant 0 : i32
    return %arg0, %c0_i32, %c0_i32_0 : i32, i32, i32
  }
}

</mosaic_0001>

<bundles_post_ra>
// kernel: tpu_custom_call.1
= control target key start
LH: loop header
LB: loop body
LE: loop exit
PB: predicated region body
PF: predicated region fallthrough
CT: control target
= control target key end

     0   :  { %7 = vsyncpa [#allocation4], 0  ;;  %s614_s0 = inlined_call_operand.vmem [shape: f32[2,4,16], index: 0, kind: input, shape index: {}]   ;;  %s615_s1 = inlined_call_operand.vmem [shape: f32[12,4], index: 1, kind: input, shape index: {}]   ;;  %s616_s2 = inlined_call_operand.hbm [shape: f32[2,4,32], index: 2, kind: output, shape index: {}]  }
   0x1   :  { %9 = vsyncpa [#allocation4 + $0x1], 0  ;;  %s507_s9 = smov 0   ;;  %s509_s10 = smov 0  }
   0x2   :  { %s511_s11 = smov 0   ;;  %s513_s12 = smov 0  }
   0x3 LB: > { %s528_s13 = sadd.s32 4294967295, %s486_s12   ;;  %s361_s14 = sadd.s32 4294967294, %s486_s12   ;;  %s486_s12 = sphi %s513_s12, %s622_s12   ;;  %s482_s11 = sphi %s511_s11, %s621_s11   ;;  %s478_s10 = sphi %s509_s10, %s620_s10   ;;  %s474_s9 = sphi %s507_s9, %s619_s9  }
   0x4   : > { %s532_s15 = sadd.s32 1, %s486_s12   ;;  %s69_s16 = sadd.s32 1, %s482_s11 }
   0x5   : > { %s66_s17 = ssub.s32 %s486_s12, %s532_s15  ;;  %p79_p0 = scmp.ne.s32.totalorder %s482_s11, %s478_s10 }
   0x6   : > { %p67_p1 = scmp.eq.s32.totalorder %s66_s17, 0  ;;  %p80_p2 = scmp.eq.s32.totalorder %s528_s13, 1 }
   0x7   : > { %p85_p3 = scmp.ne.s32.totalorder %s478_s10, %s474_s9  ;;  %p86_p4 = scmp.eq.s32.totalorder %s361_s14, 1 }
   0x8   : > { %s543_s18 = scalar_select %p67_p1, %s482_s11, %s69_s16  }
   0x9   : > { %p545_p5 = por %p80_p2, %p79_p0  ;;  %p549_p6 = por %p86_p4, %p85_p3 }
   0xa   : > { %p364_p7 = scmp.ge.s32.totalorder %s486_s12, 1  ;;  %p114_p8 = scmp.lt.s32.totalorder %s486_s12, 3 }
   0xc   : > { %p115_p9 = pnand %p364_p7, %p114_p8 }
   0xd   : > { %p135_p10 = scmp.lt.s32.totalorder (!%p115_p9), %s528_s13, 1  ;;  %s489_s30 = smov (!%p115_p9), 127  }
   0xe   : > { %118 = sbr.rel (%p115_p9) target bundleno = 655 (0x28f), region = 28  ;;  %s132_s3 = sand.u32 (!%p115_p9), 1, %s478_s10  }
   0xf   : > { %s365_s4 = sshll.u32 (!%p115_p9), %s132_s3, 2  ;;  %s490_s5 = smov (!%p115_p9), 16  }
  0x10   : > { %s134_s6 = scalar_lea.vmem (!%p115_p9), [#allocation3], %s365_s4  ;;  %s371_s7 = sshll.u32 (!%p115_p9), %s528_s13, 6 }
  0x11   : > { %s302_s8 = sshll.u32 (!%p115_p9), %s134_s6, 4  ;;  %s579_s17 = scalar_lea.hbm (!%p115_p9), %s616_s2, %s371_s7  ;;  %s303_s8 = int_to_ptr.vmem [resolvable:$true] %s302_s8 }
  0x12   : > { %s289_s21 = scalar_lea.sflag (!%p115_p9), [#allocation4], %s132_s3  ;;  %s426_s22 = scalar_lea.vmem (!%p115_p9), %s303_s8, 64 }
  0x13   : > { %v140_v0 = vld [vmem:[%s615_s1] sm:$0xff]  ;;  %vm142_vm0 = vcmask 31744   ;;  %s136_s23 = scalar_select %p135_p10, %s528_s13, 1  ;;  %vm149_vm1 = vcmask 1043456   ;;  %v141_v2 = vld [vmem:[%s615_s1 + $0x8] sm:$0xf] }
  0x14   : > { %379 = vmatprep.mubr.msk.f32.mxu0 %vm142_vm0, %v140_v0  ;;  %vm228_vm2 = vcmask 125952   ;;  %v488_v3 = vmov 0.0   ;;  %vm238_vm3 = vcmask 117760   ;;  %vm286_vm4 = vcmask 257152   ;;  %p427_p11 = scmp.ne.s32.totalorder %s303_s8, %s426_s22 }
  0x15   : > { %s366_s24 = sshll.u32 %s136_s23, 2  ;;  %229 = vst.msk [vmem:[#allocation2] sm:$0xf] %vm228_vm2, %v488_v3  ;;  %230 = vst.msk [vmem:[#allocation2 + $0x4] sm:$0xf] %vm228_vm2, %v488_v3  ;;  %s491_s23 = smov [#allocation3]  }
  0x16   : > { %s138_s27 = scalar_lea.vmem %s614_s0, %s366_s24  ;;  %p428_p12 = pnand %p427_p11, %p545_p5 }
  0x17   : > { %v139_v1 = vld [vmem:[%s138_s27] sm:$0xf]  ;;  %s430_s24 = sshll.u32 %s491_s23, 4  ;;  %s431_s24 = int_to_ptr.vmem [resolvable:$false] %s430_s24 }
  0x18   : > { %377 = vmatprep.subr.msk.mxu0 %vm149_vm1, %v139_v1  ;;  %p429_p13 = pneg %p428_p12  ;;  %s432_s13 = scalar_lea.vmem %s431_s24, 128 }
  0x19   : > { %378 = vmatpush3.msk.msra.mxu0 %vm149_vm1, %v139_v1  ;;  %p433_p0 = scmp.lt.s32.totalorder %s303_s8, %s431_s24  ;;  %p434_p1 = scmp.lt.s32.totalorder %s432_s13, %s426_s22 }
  0x1a   : > { %380 = vmatmul.mubr.msk.f32.vlgmr.msra.gmra.mxu0 %vm142_vm0, %v141_v2 }
  0x1b   : > { %p435_p2 = por %p434_p1, %p433_p0 }
  0x1c   : > { %v240_v6 = vld [vmem:[#allocation2] sm:$0xf]  ;;  %v232_v13 = vld [vmem:[#allocation2 + $0x4] sm:$0xf] }
  0x1d   : > { %p436_p3 = pnand %p435_p2, %p429_p13 }
  0xda   : > { %v381_v4 = vpop.f32.mrf.mxu0 }
  0xdc   : > { %v219_v5 = vpop.f32.mrf.mxu0 }
  0xdd   : > { %v241_v7 = vrot.slane %v219_v5, 4  ;;  %234 = vrot.lane.b32.xlu0 %v219_v5, %s489_s30 }
  0xdf   : > { %v243_v8 = vadd.f32 %v241_v7, %v240_v6 }
  0xe1   : > { %244 = vst.msk [vmem:[#allocation2] sm:$0xf] %vm228_vm2, %v243_v8 }
  0xe8   : > { %v248_v9 = vld [vmem:[#allocation2] sm:$0xf] }
  0xe9   : > { %v254_v10 = vmul.f32 %v248_v9, %v248_v9  ;;  %v250_v12 = vsel %vm228_vm2, %v248_v9, 0.0 }
  0xeb   : > { %v255_v11 = vsel %vm228_vm2, %v254_v10, 0.0 }
  0xec   : > { %256 = vadd.xlane.f32.xlu1 %v255_v11 }
  0xfc   : > { %251 = vadd.xlane.f32.xlu0 %v250_v12 }
 0x14f   : > { %v235_v14 = vpop.permute.xlu0 %234 }
 0x150   : > { %v237_v15 = vadd.f32 %v235_v14, %v232_v13 }
 0x152   : > { %239 = vst.msk [vmem:[#allocation2 + $0x4] sm:$0xf] %vm238_vm3, %v237_v15 }
 0x159   : > { %v245_v16 = vld [vmem:[#allocation2 + $0x4] sm:$0xf] }
 0x15a   : > { %v246_v17 = vadd.f32 %v381_v4, %v245_v16 }
 0x15c   : > { %247 = vst.msk [vmem:[#allocation2 + $0x4] sm:$0xf] %vm238_vm3, %v246_v17 }
 0x163   : > { %v249_v18 = vld [vmem:[#allocation2 + $0x4] sm:$0xf] }
 0x164   : > { %v259_v19 = vsel %vm228_vm2, %v249_v18, 0.0  ;;  %v263_v20 = vmul.f32 %v249_v18, %v249_v18 }
 0x165   : > { %260 = vadd.xlane.f32.xlu1 %v259_v19 }
 0x166   : > { %v264_v21 = vsel %vm228_vm2, %v263_v20, 0.0 }
 0x169   : > { %265 = vadd.xlane.f32.xlu1 %v264_v21 }
 0x175   : > { %v257_v22 = vpop.xlane.xlu1 %256 }
 0x185   : > { %v252_v23 = vpop.xlane.xlu0 %251 }
 0x1ee   : > { %v261_v24 = vpop.xlane.xlu1 %260 }
 0x1ef   : > { %v262_v25 = vadd.f32 %v261_v24, %v252_v23 }
 0x1f1   : > { %v268_v26 = vmul.f32 0.032258064, %v262_v25 }
 0x1f2   : > { %v266_v27 = vpop.xlane.xlu1 %265 }
 0x1f3   : > { %v267_v28 = vadd.f32 %v266_v27, %v257_v22  ;;  %v270_v30 = vmul.f32 %v268_v26, %v268_v26  ;;  %v275_v34 = vsub.f32 %v248_v9, %v268_v26  ;;  %v279_v35 = vsub.f32 %v249_v18, %v268_v26 }
 0x1f5   : > { %v269_v29 = vmul.f32 0.032258064, %v267_v28 }
 0x1f7   : > { %v271_v31 = vsub.f32 %v269_v29, %v270_v30 }
 0x1f9   : > { %v272_v32 = vmax.f32 %v271_v31, 0.0 }
 0x1fb   : > { %v273_v33 = vadd.f32 1e-05, %v272_v32 }
 0x1fd   : > { %424 = vrsqrt.f32 %v273_v33 }
 0x20a   : > { %v425_v36 = vpop.eup %424 }
 0x20b   : > { %v280_v37 = vmul.f32 %v425_v36, %v279_v35  ;;  %v276_v38 = vmul.f32 %v425_v36, %v275_v34 }
 0x20d   : > { %v281_v39 = vmax.f32 %v280_v37, 0.0  ;;  %v277_v40 = vmax.f32 %v276_v38, 0.0 }
 0x20f   : > { %283 = vrot.lane.b32.xlu1 %v281_v39, %s490_s5  ;;  %278 = vst.msk [vmem:[%s134_s6] sm:$0xf] %vm228_vm2, %v277_v40 }
 0x281   : > { %v284_v41 = vpop.permute.xlu1 %283 }
 0x282   : > { %287 = vst.msk [vmem:[%s134_s6] sm:$0xf] %vm286_vm4, %v284_v41 }
 0x283   : > { %439 = shalt.err (!%p436_p3)
}
 0x284   : > { %s440_s25 = scalar_lea.hbm %s579_s17, 64  ;;  %s444_s28 = scalar_lea.hbm %s616_s2, 128 }
 0x285   : > { %p441_p4 = scmp.ne.s32.totalorder %s579_s17, %s440_s25  ;;  %p445_p9 = scmp.lt.s32.totalorder %s579_s17, %s616_s2 }
 0x286   : > { %p446_p10 = scmp.lt.s32.totalorder %s444_s28, %s440_s25 }
 0x287   : > { %p442_p7 = pnand %p441_p4, %p545_p5 }
 0x288   : > { %p447_p11 = por %p446_p10, %p445_p9 }
 0x289   : > { %p443_p8 = pneg %p442_p7 }
 0x28b   : > { %p448_p12 = pnand %p447_p11, %p443_p8 }
 0x28d   : > { %451 = shalt.err (!%p448_p12)
}
 0x28e   : > { %382 = dma.vmem_to_hbm [thread:$0]  (%p545_p5), %s303_s8, 64, %s579_s17, %s289_s21  }
 0x28f PF: > { %p388_p13 = scmp.ge.s32.totalorder %s486_s12, 2  ;;  %s314_s3 = sand.u32 1, %s474_s9  }
 0x290   : > { %s315_s4 = scalar_lea.sflag [#allocation4], %s314_s3 }
 0x291   : > { %p385_p0 = pnand %p388_p13, %p549_p6 }
 0x293   : > { %p386_p1 = pneg %p385_p0 }
 0x295   : > { %469 = dma.done.wait (%p386_p1), %s315_s4, 64  }
 0x296   : > { %471 = vsyncadd (%p386_p1), %s315_s4, 4294967232  ;;  %p12_p2 = scmp.ge.s32.totalorder %s532_s15, 4   ;;  %s619_s9 = smov %s478_s10 }
 0x297   : > { %s620_s10 = smov %s482_s11  ;;  %s621_s11 = smov %s543_s18 }
 0x298   : > { %s622_s12 = smov %s532_s15  ;;  %14 = sbr.rel (!%p12_p2) target bundleno = 3 (0x3), region = 64 }
 0x29d   :  { %320 = vsyncpa [#allocation4], 1 }
 0x29e   :  { %322 = vsyncpa [#allocation4 + $0x1], 1 }

</bundles_post_ra>
